<compile_context>
chip_gen: v6e
topology: v6e:2x2x1
jax: 0.10.0
libtpu: 0.0.40
codegen_flags: <defaults>
</compile_context>

<pallas_src>
import math
from functools import partial

import jax
import jax.numpy as jnp
from jax.experimental import pallas as pl
from jax.experimental.pallas import tpu as pltpu


def _round_up(x, m):
    return (x + m - 1) // m * m


# ---------------------------------------------------------------------------
# Kernel: one (row-tile i, hidden-tile k) step of  y = gelu(x @ W1) @ W2.
# Grid = (M_tiles, H_tiles); H is the reduction axis for the second matmul,
# so partial results accumulate in an f32 VMEM scratch (P3 pattern).
# ---------------------------------------------------------------------------
def mlp_kernel(x_ref, w1_ref, w2_ref, o_ref, acc_ref):
    k = pl.program_id(1)

    @pl.when(k == 0)
    def _():
        acc_ref[...] = jnp.zeros_like(acc_ref)

    # First projection on the MXU (bf16 in, f32 accumulate): (tm, th) chunk.
    h = jnp.dot(x_ref[...], w1_ref[...], preferred_element_type=jnp.float32)

    # Exact GELU (matches nn.GELU default): 0.5*h*(1+erf(h/sqrt(2))),
    # applied in f32 on the accumulator before the bf16 downcast.
    inv_sqrt2 = jnp.float32(1.0 / math.sqrt(2.0))
    h = 0.5 * h * (1.0 + jax.lax.erf(h * inv_sqrt2))

    # Second projection: this H-chunk's contribution to y, accumulated in f32.
    acc_ref[...] += jnp.dot(h.astype(w2_ref.dtype), w2_ref[...],
                            preferred_element_type=jnp.float32)

    @pl.when(k == pl.num_programs(1) - 1)
    def _():
        # Dropout(p=0.0) is the identity.
        o_ref[...] = acc_ref[...].astype(o_ref.dtype)


# ---------------------------------------------------------------------------
# Wrapper: (B, T, C) -> (M, C); pads M up to the row tile; bf16 compute.
# ---------------------------------------------------------------------------
@partial(jax.jit, static_argnames=("tm", "th"))
def mlp_forward(x, w1, w2, *, tm=256, th=512):
    B, T, C = x.shape
    H = w1.shape[1]
    M = B * T

    # Row tile: big by default (good for v5e/v6e/v7x MXU), but shrink for tiny
    # demo problems so we don't pad 16 rows up to 256.  Keep sublane alignment.
    tm_eff = min(tm, _round_up(M, 8))
    # Hidden tile: must evenly divide H (H = 4*C is 128-aligned for GPT widths);
    # fall back to fully-resident weights if it doesn't.
    th_eff = min(th, H)
    if H % th_eff != 0:
        th_eff = H

    M_pad = _round_up(M, tm_eff)

    x2d = x.reshape(M, C)
    if M_pad != M:
        x2d = jnp.pad(x2d, ((0, M_pad - M), (0, 0)))

    # bf16-native MXU path; accumulation stays f32 inside the kernel.
    x_bf = x2d.astype(jnp.bfloat16)
    w1_bf = w1.astype(jnp.bfloat16)
    w2_bf = w2.astype(jnp.bfloat16)

    grid = (M_pad // tm_eff, H // th_eff)

    cost = pl.CostEstimate(
        flops=4 * M_pad * C * H,                       # two GEMMs
        transcendentals=M_pad * H,                     # erf per hidden element
        bytes_accessed=2 * (M_pad * C + C * H + H * C) # bf16 x, W1, W2
        + M_pad * C * x.dtype.itemsize,                # output
    )

    out2d = pl.pallas_call(
        mlp_kernel,
        out_shape=jax.ShapeDtypeStruct((M_pad, C), x.dtype),
        grid_spec=pltpu.PrefetchScalarGridSpec(
            num_scalar_prefetch=0,
            grid=grid,
            in_specs=[
                # x row tile: resident across the H axis (fetched once per i).
                pl.BlockSpec((tm_eff, C), lambda i, k: (i, 0)),
                # W1 column block and W2 row block stream along the H axis.
                pl.BlockSpec((C, th_eff), lambda i, k: (0, k)),
                pl.BlockSpec((th_eff, C), lambda i, k: (k, 0)),
            ],
            out_specs=pl.BlockSpec((tm_eff, C), lambda i, k: (i, 0)),
            scratch_shapes=[pltpu.VMEM((tm_eff, C), jnp.float32)],
        ),
        compiler_params=pltpu.CompilerParams(
            # M axis parallel (v7x megacore sharding), H axis is a reduction.
            dimension_semantics=("parallel", "arbitrary"),
            vmem_limit_bytes=48 * 1024 * 1024,
        ),
        cost_estimate=cost,
    )(x_bf, w1_bf, w2_bf)

    return out2d[:M].reshape(B, T, C)


# Reference with the same bf16-input / f32-accumulate numerics as the kernel.
def mlp_ref_bf16(x, w1, w2):
    xb = x.astype(jnp.bfloat16)
    w1b = w1.astype(jnp.bfloat16)
    w2b = w2.astype(jnp.bfloat16)
    h = jnp.dot(xb, w1b, preferred_element_type=jnp.float32)
    h = jax.nn.gelu(h, approximate=False)
    y = jnp.dot(h.astype(jnp.bfloat16), w2b, preferred_element_type=jnp.float32)
    return y.astype(x.dtype)


if __name__ == "__main__":
    key = jax.random.PRNGKey(0)
    initializer_range = 0.01

    # Test 1: small shapes consistent with the module (scaled-down GPT MLP):
    #   batch=2, seq=8, n_embd=128, n_inner=4*n_embd=512
    B, T, C = 2, 8, 128
    H = 4 * C
    kx, k1, k2, key = jax.random.split(key, 4)
    x = jax.random.normal(kx, (B, T, C), dtype=jnp.float32)
    w1 = jax.random.normal(k1, (C, H), dtype=jnp.float32) * initializer_range
    w2 = jax.random.normal(k2, (H, C), dtype=jnp.float32) * initializer_range

    y = mlp_forward(x, w1, w2)
    jax.block_until_ready(y)
    assert y.shape == (B, T, C)
    assert jnp.allclose(y, mlp_ref_bf16(x, w1, w2), atol=1e-2, rtol=1e-2), \
        "mismatch vs reference (test 1)"

    # Test 2: exercises the multi-tile H (reduction) grid axis + big row tile.
    B2, T2, C2 = 2, 128, 256
    H2 = 4 * C2
    kx, k1, k2, key = jax.random.split(key, 4)
    x2 = jax.random.normal(kx, (B2, T2, C2), dtype=jnp.float32)
    w1_2 = jax.random.normal(k1, (C2, H2), dtype=jnp.float32) * initializer_range
    w2_2 = jax.random.normal(k2, (H2, C2), dtype=jnp.float32) * initializer_range

    y2 = mlp_forward(x2, w1_2, w2_2)
    jax.block_until_ready(y2)
    assert y2.shape == (B2, T2, C2)
    assert jnp.allclose(y2, mlp_ref_bf16(x2, w1_2, w2_2), atol=1e-2, rtol=1e-2), \
        "mismatch vs reference (test 2)"

    # TODO(synk): dropout with p>0 would need pltpu.prng_seed/prng_random_bits;
    # with args.dropout == 0.0 it is the identity and is omitted.
    print("KERNEL_OK")
</pallas_src>

<mosaic_0001>
module attributes {stable_mosaic.version = 11 : i64} {
  func.func @mlp_kernel(%arg0: i32, %arg1: i32, %arg2: memref<16x128xbf16, #tpu.memory_space<vmem>>, %arg3: memref<128x512xbf16, #tpu.memory_space<vmem>>, %arg4: memref<512x128xbf16, #tpu.memory_space<vmem>>, %arg5: memref<16x128xf32, #tpu.memory_space<vmem>>, %arg6: memref<16x128xf32, #tpu.memory_space<vmem>>) attributes {dimension_semantics = [#tpu.dimension_semantics<parallel>, #tpu.dimension_semantics<arbitrary>], iteration_bounds = array<i64: 1, 1>, scalar_prefetch = 0 : i64, scratch_operands = 1 : i64, tpu.core_type = #tpu.core_type<tc>, window_params = [{transform_indices = @transform_0, window_bounds = array<i64: 16, 128>}, {transform_indices = @transform_1, window_bounds = array<i64: 128, 512>}, {transform_indices = @transform_2, window_bounds = array<i64: 512, 128>}, {transform_indices = @transform_3, window_bounds = array<i64: 16, 128>}]} {
    %c0_i32 = arith.constant 0 : i32
    %0 = arith.cmpi eq, %arg1, %c0_i32 : i32
    %1 = arith.extui %0 : i1 to i32
    %c0_i32_0 = arith.constant 0 : i32
    %2 = arith.cmpi ne, %1, %c0_i32_0 : i32
    scf.if %2 {
      %cst_16 = arith.constant 0.000000e+00 : f32
      %23 = vector.broadcast %cst_16 : f32 to vector<16x128xf32>
      %c0_17 = arith.constant 0 : index
      %c0_18 = arith.constant 0 : index
      %24 = vector.load %arg6[%c0_17, %c0_18] : memref<16x128xf32, #tpu.memory_space<vmem>>, vector<16x128xf32>
      tpu.vector_store %arg6[%c0_17, %c0_18], %23 {strides = array<i32>} : memref<16x128xf32, #tpu.memory_space<vmem>>, vector<16x128xf32>,
    } else {
    }
    %c0 = arith.constant 0 : index
    %c0_1 = arith.constant 0 : index
    %3 = vector.load %arg2[%c0, %c0_1] : memref<16x128xbf16, #tpu.memory_space<vmem>>, vector<16x128xbf16>
    %c0_2 = arith.constant 0 : index
    %c0_3 = arith.constant 0 : index
    %4 = vector.load %arg3[%c0_2, %c0_3] : memref<128x512xbf16, #tpu.memory_space<vmem>>, vector<128x512xbf16>
    %cst = arith.constant dense<0.000000e+00> : vector<16x512xf32>
    %5 = tpu.matmul %3, %4, %cst {dimension_numbers = #tpu.dot_dimension_numbers<[1], [0], [0], [1], [0, 0, 1, 1], [], []>} : vector<16x128xbf16>, vector<128x512xbf16>, vector<16x512xf32> -> vector<16x512xf32>
    %cst_4 = arith.constant 5.000000e-01 : f32
    %6 = vector.broadcast %cst_4 : f32 to vector<16x512xf32>
    %7 = arith.mulf %6, %5 : vector<16x512xf32>
    %cst_5 = arith.constant 0.707106769 : f32
    %8 = vector.broadcast %cst_5 : f32 to vector<16x512xf32>
    %9 = arith.mulf %5, %8 : vector<16x512xf32>
    %10 = math.erf %9 : vector<16x512xf32>
    %cst_6 = arith.constant 1.000000e+00 : f32
    %11 = vector.broadcast %cst_6 : f32 to vector<16x512xf32>
    %12 = arith.addf %11, %10 : vector<16x512xf32>
    %13 = arith.mulf %7, %12 : vector<16x512xf32>
    %c0_7 = arith.constant 0 : index
    %c0_8 = arith.constant 0 : index
    %14 = vector.load %arg6[%c0_7, %c0_8] : memref<16x128xf32, #tpu.memory_space<vmem>>, vector<16x128xf32>
    %15 = arith.truncf %13 : vector<16x512xf32> to vector<16x512xbf16>
    %c0_9 = arith.constant 0 : index
    %c0_10 = arith.constant 0 : index
    %16 = vector.load %arg4[%c0_9, %c0_10] : memref<512x128xbf16, #tpu.memory_space<vmem>>, vector<512x128xbf16>
    %cst_11 = arith.constant dense<0.000000e+00> : vector<16x128xf32>
    %17 = tpu.matmul %15, %16, %cst_11 {dimension_numbers = #tpu.dot_dimension_numbers<[1], [0], [0], [1], [0, 0, 1, 1], [], []>} : vector<16x512xbf16>, vector<512x128xbf16>, vector<16x128xf32> -> vector<16x128xf32>
    %18 = arith.addf %14, %17 : vector<16x128xf32>
    %c0_12 = arith.constant 0 : index
    %c0_13 = arith.constant 0 : index
    %19 = vector.load %arg6[%c0_12, %c0_13] : memref<16x128xf32, #tpu.memory_space<vmem>>, vector<16x128xf32>
    tpu.vector_store %arg6[%c0_12, %c0_13], %18 {strides = array<i32>} : memref<16x128xf32, #tpu.memory_space<vmem>>, vector<16x128xf32>,
    %c0_i32_14 = arith.constant 0 : i32
    %20 = arith.cmpi eq, %arg1, %c0_i32_14 : i32
    %21 = arith.extui %20 : i1 to i32
    %c0_i32_15 = arith.constant 0 : i32
    %22 = arith.cmpi ne, %21, %c0_i32_15 : i32
    scf.if %22 {
      %c0_16 = arith.constant 0 : index
      %c0_17 = arith.constant 0 : index
      %23 = vector.load %arg6[%c0_16, %c0_17] : memref<16x128xf32, #tpu.memory_space<vmem>>, vector<16x128xf32>
      %c0_18 = arith.constant 0 : index
      %c0_19 = arith.constant 0 : index
      %24 = vector.load %arg5[%c0_18, %c0_19] : memref<16x128xf32, #tpu.memory_space<vmem>>, vector<16x128xf32>
      tpu.vector_store %arg5[%c0_18, %c0_19], %23 {strides = array<i32>} : memref<16x128xf32, #tpu.memory_space<vmem>>, vector<16x128xf32>,
    } else {
    }
    return
  }
  func.func @transform_0(%arg0: i32, %arg1: i32) -> (i32, i32) {
    %c0_i32 = arith.constant 0 : i32
    %c0_i32_0 = arith.constant 0 : i32
    return %arg0, %c0_i32 : i32, i32
  }
  func.func @transform_1(%arg0: i32, %arg1: i32) -> (i32, i32) {
    %c0_i32 = arith.constant 0 : i32
    %c0_i32_0 = arith.constant 0 : i32
    return %c0_i32, %arg1 : i32, i32
  }
  func.func @transform_2(%arg0: i32, %arg1: i32) -> (i32, i32) {
    %c0_i32 = arith.constant 0 : i32
    %c0_i32_0 = arith.constant 0 : i32
    return %arg1, %c0_i32 : i32, i32
  }
  func.func @transform_3(%arg0: i32, %arg1: i32) -> (i32, i32) {
    %c0_i32 = arith.constant 0 : i32
    %c0_i32_0 = arith.constant 0 : i32
    return %arg0, %c0_i32 : i32, i32
  }
}

</mosaic_0001>

<bundles_post_ra>
// kernel: mlp_forward.1
= control target key start
LH: loop header
LB: loop body
LE: loop exit
PB: predicated region body
PF: predicated region fallthrough
CT: control target
= control target key end

     0   :  { %v951_v2 = vmov 0   ;;  %s1173_s0 = inlined_call_operand.vmem [shape: bf16[16,128], index: 0, kind: input, shape index: {}]   ;;  %s1174_s1 = inlined_call_operand.vmem [shape: bf16[128,512], index: 1, kind: input, shape index: {}]   ;;  %s1175_s2 = inlined_call_operand.vmem [shape: bf16[512,128], index: 2, kind: input, shape index: {}]   ;;  %s1176_s3 = inlined_call_operand.hbm [shape: f32[16,128], index: 3, kind: output, shape index: {}]  }
   0x1   :  { %v832_v0 = vld [vmem:[%s1174_s1 + $0xe4] ss:$16 sps:$4 sm:$0xff]   ;;  %v834_v1 = vld [vmem:[%s1174_s1 + $0xec] ss:$16 sps:$4 sm:$0xff]   ;;  %254 = vmatprep.mubr.bf16.mxu0 %v951_v2  ;;  %297 = vmatprep.mubr.bf16.mxu1 %v951_v2  ;;  %v836_v3 = vld [vmem:[%s1174_s1 + $0xe0] ss:$16 sps:$4 sm:$0xff]  }
   0x2   :  { %222 = vmatprep.subr.bf16.mxu0 %v832_v0  ;;  %v837_v4 = vld [vmem:[%s1174_s1 + $0xe8] ss:$16 sps:$4 sm:$0xff]   ;;  %265 = vmatprep.subr.bf16.mxu1 %v834_v1  ;;  %v838_v5 = vld [vmem:[%s1174_s1 + $0xc4] ss:$16 sps:$4 sm:$0xff]   ;;  %v840_v6 = vld [vmem:[%s1174_s1 + $0xcc] ss:$16 sps:$4 sm:$0xff]  }
   0x3   :  { %223 = vmatpush1.bf16.msra.mxu0 %v836_v3  ;;  %266 = vmatpush1.bf16.msra.mxu1 %v837_v4  ;;  %v842_v7 = vld [vmem:[%s1174_s1 + $0xc0] ss:$16 sps:$4 sm:$0xff]   ;;  %v843_v8 = vld [vmem:[%s1174_s1 + $0xc8] ss:$16 sps:$4 sm:$0xff]   ;;  %v844_v9 = vld [vmem:[%s1174_s1 + $0xa4] ss:$16 sps:$4 sm:$0xff]  }
   0x4   :  { %224 = vmatprep.subr.bf16.mxu0 %v838_v5  ;;  %267 = vmatprep.subr.bf16.mxu1 %v840_v6  ;;  %v846_v10 = vld [vmem:[%s1174_s1 + $0xac] ss:$16 sps:$4 sm:$0xff]   ;;  %v848_v11 = vld [vmem:[%s1174_s1 + $0xa0] ss:$16 sps:$4 sm:$0xff]   ;;  %v849_v12 = vld [vmem:[%s1174_s1 + $0xa8] ss:$16 sps:$4 sm:$0xff]  }
   0x5   :  { %v850_v13 = vld [vmem:[%s1174_s1 + $0x84] ss:$16 sps:$4 sm:$0xff]   ;;  %v852_v14 = vld [vmem:[%s1174_s1 + $0x8c] ss:$16 sps:$4 sm:$0xff]   ;;  %v854_v15 = vld [vmem:[%s1174_s1 + $0x80] ss:$16 sps:$4 sm:$0xff]  }
   0x6   :  { %v855_v16 = vld [vmem:[%s1174_s1 + $0x88] ss:$16 sps:$4 sm:$0xff]   ;;  %v856_v17 = vld [vmem:[%s1174_s1 + $0x64] ss:$16 sps:$4 sm:$0xff]   ;;  %v858_v18 = vld [vmem:[%s1174_s1 + $0x6c] ss:$16 sps:$4 sm:$0xff]  }
   0x7   :  { %225 = vmatpush1.bf16.msra.mxu0 %v842_v7  ;;  %268 = vmatpush1.bf16.msra.mxu1 %v843_v8  ;;  %v860_v19 = vld [vmem:[%s1174_s1 + $0x60] ss:$16 sps:$4 sm:$0xff]   ;;  %v861_v20 = vld [vmem:[%s1174_s1 + $0x68] ss:$16 sps:$4 sm:$0xff]   ;;  %v862_v21 = vld [vmem:[%s1174_s1 + $0x44] ss:$16 sps:$4 sm:$0xff]  }
   0x8   :  { %226 = vmatprep.subr.bf16.mxu0 %v844_v9  ;;  %269 = vmatprep.subr.bf16.mxu1 %v846_v10  ;;  %v864_v22 = vld [vmem:[%s1174_s1 + $0x4c] ss:$16 sps:$4 sm:$0xff]   ;;  %v866_v23 = vld [vmem:[%s1174_s1 + $0x40] ss:$16 sps:$4 sm:$0xff]   ;;  %v867_v24 = vld [vmem:[%s1174_s1 + $0x48] ss:$16 sps:$4 sm:$0xff]  }
   0x9   :  { %v868_v25 = vld [vmem:[%s1174_s1 + $0x24] ss:$16 sps:$4 sm:$0xff]   ;;  %v870_v26 = vld [vmem:[%s1174_s1 + $0x2c] ss:$16 sps:$4 sm:$0xff]   ;;  %v872_v27 = vld [vmem:[%s1174_s1 + $0x20] ss:$16 sps:$4 sm:$0xff]  }
   0xa   :  { %v873_v28 = vld [vmem:[%s1174_s1 + $0x28] ss:$16 sps:$4 sm:$0xff]   ;;  %v874_v29 = vld [vmem:[%s1174_s1 + $0x4] ss:$16 sps:$4 sm:$0xff]   ;;  %v876_v30 = vld [vmem:[%s1174_s1 + $0xc] ss:$16 sps:$4 sm:$0xff]  }
   0xb   :  { %227 = vmatpush1.bf16.msra.mxu0 %v848_v11  ;;  %270 = vmatpush1.bf16.msra.mxu1 %v849_v12  ;;  %v878_v31 = vld [vmem:[%s1174_s1] ss:$16 sps:$4 sm:$0xff]   ;;  %v879_v32 = vld [vmem:[%s1174_s1 + $0x8] ss:$16 sps:$4 sm:$0xff]  }
   0xc   :  { %228 = vmatprep.subr.bf16.mxu0 %v850_v13  ;;  %271 = vmatprep.subr.bf16.mxu1 %v852_v14  ;;  %v881_v33 = vld [vmem:[%s1175_s2 + $0x78] sm:$0xff]   ;;  %v880_v35 = vld [vmem:[%s1173_s0] sm:$0xff]  }
   0xd   :  { %v882_v34 = vld [vmem:[%s1175_s2 + $0xf8] sm:$0xff]  }
   0xe   :  { %v883_v36 = vld [vmem:[%s1175_s2 + $0x38] sm:$0xff]  }
   0xf   :  { %229 = vmatpush1.bf16.msra.mxu0 %v854_v15  ;;  %272 = vmatpush1.bf16.msra.mxu1 %v855_v16  ;;  %v884_v37 = vld [vmem:[%s1175_s2 + $0xb8] sm:$0xff]  }
  0x10   :  { %230 = vmatprep.subr.bf16.mxu0 %v856_v17  ;;  %273 = vmatprep.subr.bf16.mxu1 %v858_v18 }
  0x13   :  { %231 = vmatpush1.bf16.msra.mxu0 %v860_v19  ;;  %274 = vmatpush1.bf16.msra.mxu1 %v861_v20 }
  0x14   :  { %232 = vmatprep.subr.bf16.mxu0 %v862_v21  ;;  %275 = vmatprep.subr.bf16.mxu1 %v864_v22 }
  0x17   :  { %233 = vmatpush1.bf16.msra.mxu0 %v866_v23  ;;  %276 = vmatpush1.bf16.msra.mxu1 %v867_v24 }
  0x18   :  { %234 = vmatprep.subr.bf16.mxu0 %v868_v25  ;;  %277 = vmatprep.subr.bf16.mxu1 %v870_v26 }
  0x1b   :  { %235 = vmatpush1.bf16.msra.mxu0 %v872_v27  ;;  %278 = vmatpush1.bf16.msra.mxu1 %v873_v28 }
  0x1c   :  { %236 = vmatprep.subr.bf16.mxu0 %v874_v29  ;;  %279 = vmatprep.subr.bf16.mxu1 %v876_v30 }
  0x1f   :  { %237 = vmatpush1.bf16.msra.mxu0 %v878_v31  ;;  %280 = vmatpush1.bf16.msra.mxu1 %v879_v32 }
  0x20   :  { %784 = vmatprep.subr.bf16.mxu0 %v881_v33  ;;  %806 = vmatprep.subr.bf16.mxu1 %v882_v34 }
  0x22   :  { %255 = vmatmul.mubr.bf16.vlgmr.msra.gmra.mxu0 %v880_v35  ;;  %298 = vmatmul.mubr.bf16.vlgmr.msra.gmra.mxu1 %v880_v35 }
  0x23   :  { %785 = vmatpush3.bf16.msra.mxu0 %v883_v36  ;;  %807 = vmatpush3.bf16.msra.mxu1 %v884_v37 }
  0x24   :  { %8 = vsyncpa [#allocation4], 0  ;;  %v885_v38 = vld [vmem:[%s1175_s2 + $0x70] sm:$0xff]   ;;  %v889_v42 = vld [vmem:[%s1175_s2 + $0x68] sm:$0xff]  }
  0x25   :  { %v886_v39 = vld [vmem:[%s1175_s2 + $0xf0] sm:$0xff]   ;;  %786 = vmatprep.subr.bf16.mxu0 %v885_v38  ;;  %v890_v43 = vld [vmem:[%s1175_s2 + $0xe8] sm:$0xff]   ;;  %v893_v46 = vld [vmem:[%s1175_s2 + $0x60] sm:$0xff]  }
  0x26   :  { %v887_v40 = vld [vmem:[%s1175_s2 + $0x30] sm:$0xff]   ;;  %808 = vmatprep.subr.bf16.mxu1 %v886_v39  ;;  %v891_v44 = vld [vmem:[%s1175_s2 + $0x28] sm:$0xff]   ;;  %v894_v47 = vld [vmem:[%s1175_s2 + $0xe0] sm:$0xff]  }
  0x27   :  { %v888_v41 = vld [vmem:[%s1175_s2 + $0xb0] sm:$0xff]   ;;  %787 = vmatpush3.bf16.msra.mxu0 %v887_v40  ;;  %v892_v45 = vld [vmem:[%s1175_s2 + $0xa8] sm:$0xff]   ;;  %v895_v48 = vld [vmem:[%s1175_s2 + $0x20] sm:$0xff]  }
  0x28   :  { %809 = vmatpush3.bf16.msra.mxu1 %v888_v41  ;;  %788 = vmatprep.subr.bf16.mxu0 %v889_v42  ;;  %v896_v49 = vld [vmem:[%s1175_s2 + $0xa0] sm:$0xff]   ;;  %v897_v50 = vld [vmem:[%s1175_s2 + $0x58] sm:$0xff]   ;;  %v901_v54 = vld [vmem:[%s1175_s2 + $0x50] sm:$0xff]  }
  0x29   :  { %810 = vmatprep.subr.bf16.mxu1 %v890_v43  ;;  %v898_v51 = vld [vmem:[%s1175_s2 + $0xd8] sm:$0xff]   ;;  %v902_v55 = vld [vmem:[%s1175_s2 + $0xd0] sm:$0xff]   ;;  %v905_v58 = vld [vmem:[%s1175_s2 + $0x48] sm:$0xff]  }
  0x2a   :  { %v899_v52 = vld [vmem:[%s1175_s2 + $0x18] sm:$0xff]   ;;  %v903_v56 = vld [vmem:[%s1175_s2 + $0x10] sm:$0xff]   ;;  %v906_v59 = vld [vmem:[%s1175_s2 + $0xc8] sm:$0xff]  }
  0x2b   :  { %789 = vmatpush3.bf16.msra.mxu0 %v891_v44  ;;  %v900_v53 = vld [vmem:[%s1175_s2 + $0x98] sm:$0xff]   ;;  %v904_v57 = vld [vmem:[%s1175_s2 + $0x90] sm:$0xff]   ;;  %v907_v60 = vld [vmem:[%s1175_s2 + $0x8] sm:$0xff]  }
  0x2c   :  { %811 = vmatpush3.bf16.msra.mxu1 %v892_v45  ;;  %790 = vmatprep.subr.bf16.mxu0 %v893_v46  ;;  %v908_v61 = vld [vmem:[%s1175_s2 + $0x88] sm:$0xff]   ;;  %v909_v62 = vld [vmem:[%s1175_s2 + $0x40] sm:$0xff]  }
  0x2d   :  { %812 = vmatprep.subr.bf16.mxu1 %v894_v47  ;;  %v910_v63 = vld [vmem:[%s1175_s2 + $0xc0] sm:$0xff]  }
  0x2e   :  { %v911_v0 = vld [vmem:[%s1175_s2] sm:$0xff]  }
  0x2f   :  { %791 = vmatpush3.bf16.msra.mxu0 %v895_v48  ;;  %v912_v1 = vld [vmem:[%s1175_s2 + $0x80] sm:$0xff]   ;;  %s952_s2 = smov [#allocation3]  }
  0x30   :  { %813 = vmatpush3.bf16.msra.mxu1 %v896_v49  ;;  %792 = vmatprep.subr.bf16.mxu0 %v897_v50  ;;  %s708_s1 = sshll.u32 %s952_s2, 4  ;;  %s709_s1 = int_to_ptr.vmem [resolvable:$true] %s708_s1 }
  0x31   :  { %814 = vmatprep.subr.bf16.mxu1 %v898_v51  ;;  %s929_s30 = scalar_lea.vmem %s709_s1, 256  ;;  %p934_p1 = scmp.lt.s32.totalorder %s709_s1, %s709_s1 }
  0x32   :  { %p930_p0 = scmp.ne.s32.totalorder %s709_s1, %s929_s30  ;;  %p935_p2 = scmp.lt.s32.totalorder %s929_s30, %s929_s30 }
  0x33   :  { %793 = vmatpush3.bf16.msra.mxu0 %v899_v52 }
  0x34   :  { %815 = vmatpush3.bf16.msra.mxu1 %v900_v53  ;;  %794 = vmatprep.subr.bf16.mxu0 %v901_v54  ;;  %p936_p3 = por %p935_p2, %p934_p1 }
  0x35   :  { %816 = vmatprep.subr.bf16.mxu1 %v902_v55 }
  0x36   :  { %p937_p4 = pnand %p936_p3, %p930_p0 }
  0x37   :  { %795 = vmatpush3.bf16.msra.mxu0 %v903_v56 }
  0x38   :  { %817 = vmatpush3.bf16.msra.mxu1 %v904_v57  ;;  %796 = vmatprep.subr.bf16.mxu0 %v905_v58 }
  0x39   :  { %818 = vmatprep.subr.bf16.mxu1 %v906_v59 }
  0x3b   :  { %797 = vmatpush3.bf16.msra.mxu0 %v907_v60 }
  0x3c   :  { %819 = vmatpush3.bf16.msra.mxu1 %v908_v61  ;;  %798 = vmatprep.subr.bf16.mxu0 %v909_v62 }
  0x3d   :  { %820 = vmatprep.subr.bf16.mxu1 %v910_v63 }
  0x3f   :  { %799 = vmatpush3.bf16.msra.mxu0 %v911_v0 }
  0x40   :  { %821 = vmatpush3.bf16.msra.mxu1 %v912_v1 }
  0xe2   :  { %v256_v2 = vpop.f32.mrf.mxu0  ;;  %v299_v3 = vpop.f32.mrf.mxu1 }
  0xe3   :  { %v316_v4 = vmul.f32 0.70710677, %v256_v2  ;;  %v318_v5 = vmul.f32 0.70710677, %v299_v3  ;;  %v308_v24 = vmul.f32 0.5, %v256_v2  ;;  %v310_v42 = vmul.f32 0.5, %v299_v3 }
  0xe4   :  { %v258_v6 = vpop.f32.mrf.mxu0  ;;  %v301_v7 = vpop.f32.mrf.mxu1 }
  0xe5   :  { %913 = verf.f32 %v316_v4  ;;  %v317_v8 = vmul.f32 0.70710677, %v258_v6  ;;  %v319_v9 = vmul.f32 0.70710677, %v301_v7  ;;  %v309_v25 = vmul.f32 0.5, %v258_v6 }
  0xe6   :  { %915 = verf.f32 %v318_v5  ;;  %v260_v10 = vpop.f32.mrf.mxu0  ;;  %v303_v11 = vpop.f32.mrf.mxu1  ;;  %v311_v38 = vmul.f32 0.5, %v301_v7 }
  0xe7   :  { %917 = verf.f32 %v317_v8  ;;  %v320_v12 = vmul.f32 0.70710677, %v260_v10  ;;  %v322_v13 = vmul.f32 0.70710677, %v303_v11  ;;  %v312_v31 = vmul.f32 0.5, %v260_v10 }
  0xe8   :  { %919 = verf.f32 %v319_v9  ;;  %v262_v14 = vpop.f32.mrf.mxu0  ;;  %v305_v15 = vpop.f32.mrf.mxu1  ;;  %v314_v35 = vmul.f32 0.5, %v303_v11 }
  0xe9   :  { %921 = verf.f32 %v320_v12  ;;  %v321_v16 = vmul.f32 0.70710677, %v262_v14  ;;  %v323_v17 = vmul.f32 0.70710677, %v305_v15  ;;  %v313_v36 = vmul.f32 0.5, %v262_v14 }
  0xea   :  { %923 = verf.f32 %v322_v13  ;;  %v315_v40 = vmul.f32 0.5, %v305_v15 }
  0xeb   :  { %925 = verf.f32 %v321_v16 }
  0xec   :  { %927 = verf.f32 %v323_v17 }
  0xf2   :  { %v914_v18 = vpop.eup %913 }
  0xf3   :  { %v916_v19 = vpop.eup %915  ;;  %v332_v29 = vadd.f32 1.0, %v914_v18 }
  0xf4   :  { %v918_v20 = vpop.eup %917  ;;  %v334_v34 = vadd.f32 1.0, %v916_v19 }
  0xf5   :  { %v920_v21 = vpop.eup %919  ;;  %v333_v26 = vadd.f32 1.0, %v918_v20  ;;  %v340_v46 = vmul.f32 %v332_v29, %v308_v24 }
  0xf6   :  { %v922_v22 = vpop.eup %921  ;;  %v335_v30 = vadd.f32 1.0, %v920_v21  ;;  %v342_v49 = vmul.f32 %v334_v34, %v310_v42 }
  0xf7   :  { %v924_v23 = vpop.eup %923  ;;  %v336_v27 = vadd.f32 1.0, %v922_v22  ;;  %v341_v43 = vmul.f32 %v333_v26, %v309_v25 }
  0xf8   :  { %v926_v28 = vpop.eup %925  ;;  %v338_v32 = vadd.f32 1.0, %v924_v23  ;;  %v343_v47 = vmul.f32 %v335_v30, %v311_v38 }
  0xf9   :  { %v928_v33 = vpop.eup %927  ;;  %v337_v37 = vadd.f32 1.0, %v926_v28  ;;  %v344_v39 = vmul.f32 %v336_v27, %v312_v31 }
  0xfa   :  { %v339_v41 = vadd.f32 1.0, %v928_v33  ;;  %v346_v44 = vmul.f32 %v338_v32, %v314_v35 }
  0xfb   :  { %v345_v45 = vmul.f32 %v337_v37, %v313_v36  ;;  %v350_v51 = vpack.c.bf16 %v344_v39, %v340_v46 }
  0xfc   :  { %v347_v48 = vmul.f32 %v339_v41, %v315_v40  ;;  %v352_v53 = vpack.c.bf16 %v346_v44, %v342_v49 }
  0xfd   :  { %v351_v50 = vpack.c.bf16 %v345_v45, %v341_v43 }
  0xfe   :  { %v353_v52 = vpack.c.bf16 %v347_v48, %v343_v47 }
  0xff   :  { %642 = vmatprep.mubr.bf16.mxu0 %v351_v50 }
 0x100   :  { %683 = vmatprep.mubr.bf16.mxu1 %v353_v52  ;;  %643 = vmatmul.mubr.bf16.vlgmr.msra.gmra.mxu0 %v350_v51 }
 0x101   :  { %684 = vmatmul.mubr.bf16.vlgmr.msra.gmra.mxu1 %v352_v53 }
 0x1c0   :  { %v800_v54 = vpop.f32.mrf.mxu0 }
 0x1c1   :  { %v822_v55 = vpop.f32.mrf.mxu1 }
 0x1c2   :  { %v801_v56 = vpop.f32.mrf.mxu0 }
 0x1c3   :  { %v802_v57 = vadd.f32 %v801_v56, %v800_v54  ;;  %v823_v58 = vpop.f32.mrf.mxu1 }
 0x1c4   :  { %v824_v59 = vadd.f32 %v823_v58, %v822_v55  ;;  %v803_v60 = vpop.f32.mrf.mxu0 }
 0x1c5   :  { %v825_v61 = vpop.f32.mrf.mxu1 }
 0x1c6   :  { %v686_v62 = vadd.f32 %v824_v59, %v802_v57  ;;  %v804_v63 = vpop.f32.mrf.mxu0 }
 0x1c7   :  { %v805_v0 = vadd.f32 %v804_v63, %v803_v60  ;;  %v826_v1 = vpop.f32.mrf.mxu1 }
 0x1c8   :  { %701 = vst [vmem:[#allocation3] sm:$0xff] %v686_v62  ;;  %v827_v2 = vadd.f32 %v826_v1, %v825_v61 }
 0x1ca   :  { %v689_v3 = vadd.f32 %v827_v2, %v805_v0 }
 0x1cc   :  { %702 = vst [vmem:[#allocation3 + $0x8] sm:$0xff] %v689_v3 }
 0x1cd   :  { %940 = shalt.err (!%p937_p4)
}
 0x1ce   :  { %s953_s4 = smov 128   ;;  %s954_s5 = smov 8  }
 0x1cf   :  { %714 = dma.vmem_to_hbm [thread:$0]  %s709_s1, 256, %s1176_s3, [#allocation4], %s953_s4, %s953_s4, %s954_s5  }
 0x1d0   :  { %949 = dma.done.wait [#allocation4], 256  }
 0x1d1   :  { %950 = vsyncadd [#allocation4], 4294967040 }
 0x1d2   :  { %718 = vsyncpa [#allocation4], 1 }

</bundles_post_ra>
